<compile_context>
chip_gen: v6e
topology: v6e:2x2x1
jax: 0.10.0
libtpu: 0.0.40
codegen_flags: <defaults>
</compile_context>

<pallas_src>
import jax
import jax.numpy as jnp
from jax.experimental import pallas as pl
from jax.experimental.pallas import tpu as pltpu

FEATURE_COUNT = 16      # dataSetClass.featureCount (synthetic)
OUTPUT_COUNT = 4        # dataSetClass.outputCount  (synthetic)
WIDTH = 60              # generalWidth = width0 = width1 = width2
W_PAD = 64              # hidden width padded to the sublane grain
OUT_PAD = 8             # output rows padded to the sublane grain
BN_EPS = 1e-5
SWAP = False            # dataSetClass.swap
TILE_N = 8192           # default batch tile (rows); tunable via tile_rows=
LANE = 128              # batch-tile grain (batch sits on the lane axis)


def _mlp_kernel(x_ref, w1_ref, b1_ref, w2_ref, b2_ref,
                w3_ref, b3_ref, w4_ref, b4_ref, o_ref):
    """One batch tile, fully transposed layout.

    x_ref:  [F, tile_n]          (batch on lanes)
    wN_ref: [out, in]            (pre-transposed, padded)
    bN_ref: [out, 1]
    o_ref:  [OUT_PAD, tile_n]    (lane-dense store, no in-kernel transpose)
    BatchNorm is already folded into w1/b1 by the wrapper.
    """
    # Layer 1 kept in f32 (folded BN scale can be large for tiny batch variance).
    h = jnp.dot(w1_ref[...], x_ref[...], preferred_element_type=jnp.float32)
    h = jnp.maximum(h + b1_ref[...], 0.0).astype(w2_ref.dtype)

    h = jnp.dot(w2_ref[...], h, preferred_element_type=jnp.float32)
    h = jnp.maximum(h + b2_ref[...], 0.0).astype(w3_ref.dtype)

    h = jnp.dot(w3_ref[...], h, preferred_element_type=jnp.float32)
    h = jnp.maximum(h + b3_ref[...], 0.0).astype(w4_ref.dtype)

    y = jnp.dot(w4_ref[...], h, preferred_element_type=jnp.float32) + b4_ref[...]

    if SWAP:
        y = (jnp.tanh(y) + 1.0) * 0.5 * 0.4 + 0.001
    else:
        y = (jnp.tanh(y) + 1.0) * 0.5 * 0.9 + 0.1

    o_ref[...] = y.astype(o_ref.dtype)


def _round_up(v, m):
    return (v + m - 1) // m * m


def _default_use_bf16():
    """bf16 matmuls on v6e/v7x; keep f32 on v5e (no native bf16 VPU/EUP)."""
    try:
        kind = jax.devices()[0].device_kind.lower()
    except Exception:
        return True
    if "v5e" in kind or "v5 lite" in kind or "v5litepod" in kind:
        return False
    return True


def net_forward(x, params, *, use_bf16=None, tile_rows=TILE_N,
                transposed_output=False, xla_fallback_below=0):
    """Forward pass of `Net`. x: [N, FEATURE_COUNT] -> [N, OUTPUT_COUNT].

    use_bf16:          None = auto (True on v6e/v7x, False on v5e).  Layers 2-4
                       run in bf16 with f32 accumulation; layer 1 stays f32.
    tile_rows:         batch-tile size (rows).  Big tiles amortize per-grid-step
                       overhead; the tile count is rounded up to an even number
                       on multi-tile grids for v7x TensorCore balance.
    transposed_output: return [OUTPUT_COUNT, N] directly (skips the wrapper
                       transpose) if downstream code can consume that layout.
    xla_fallback_below: below this batch size run the plain-XLA reference path.
    """
    n = x.shape[0]
    if n < xla_fallback_below:
        y = _reference(x, params)
        return jnp.transpose(y) if transposed_output else y

    if use_bf16 is None:
        use_bf16 = _default_use_bf16()

    x = x.astype(jnp.float32)

    # --- BatchNorm1d over the FULL batch (training-mode, biased variance),
    #     folded into fc1:  BN(x) @ w1 + b1 == x @ (scale*w1) + (b1 + shift@w1)
    mean = jnp.mean(x, axis=0, keepdims=True)                       # [1, F]
    var = jnp.mean(jnp.square(x - mean), axis=0, keepdims=True)     # [1, F]
    scale = params["bn_gamma"] * jax.lax.rsqrt(var + BN_EPS)        # [1, F]
    shift = params["bn_beta"] - mean * scale                        # [1, F]
    w1f = jnp.reshape(scale, (-1, 1)) * params["w1"]                # [F, W]
    b1f = params["b1"] + shift @ params["w1"]                       # [1, W]

    # --- pre-transpose weights to [out, in], pad 60 -> 64 / 4 -> 8 (zero fill)
    def pad_t(w, rows, cols, dt):
        wt = jnp.transpose(w)                                       # [out, in]
        return jnp.pad(wt, ((0, rows - wt.shape[0]),
                            (0, cols - wt.shape[1]))).astype(dt)

    def pad_b(b, rows):
        bt = jnp.reshape(b, (-1, 1))                                # [out, 1]
        return jnp.pad(bt, ((0, rows - bt.shape[0]), (0, 0))).astype(jnp.float32)

    w_dt = jnp.bfloat16 if use_bf16 else jnp.float32
    w1p = pad_t(w1f, W_PAD, FEATURE_COUNT, jnp.float32)   # layer-1 stays f32
    b1p = pad_b(b1f, W_PAD)
    w2p = pad_t(params["w2"], W_PAD, W_PAD, w_dt)
    b2p = pad_b(params["b2"], W_PAD)
    w3p = pad_t(params["w3"], W_PAD, W_PAD, w_dt)
    b3p = pad_b(params["b3"], W_PAD)
    w4p = pad_t(params["w4"], OUT_PAD, W_PAD, w_dt)
    b4p = pad_b(params["b4"], OUT_PAD)

    # --- batch tiling: lane grain 128; even tile count when multi-tile (v7x)
    if n <= tile_rows:
        num_tiles = 1
        tile_n = _round_up(n, LANE)
    else:
        num_tiles = -(-n // tile_rows)
        if num_tiles % 2:
            num_tiles += 1           # keep both v7x TensorCores equally loaded
        tile_n = _round_up(-(-n // num_tiles), LANE)
    n_pad = tile_n * num_tiles

    # x^T in the wrapper (one cheap XLA pass) -> no in-kernel transposes at all.
    xt = jnp.transpose(jnp.pad(x, ((0, n_pad - n), (0, 0))))        # [F, n_pad]

    grid = (num_tiles,)
    args = (xt, w1p, b1p, w2p, b2p, w3p, b3p, w4p, b4p)

    def _resident(a):
        # constant block index -> weights/biases stay VMEM-resident across grid
        return pl.BlockSpec(a.shape, lambda i: (0, 0))

    in_specs = [pl.BlockSpec((FEATURE_COUNT, tile_n), lambda i: (0, i))]
    in_specs += [_resident(a) for a in args[1:]]
    out_specs = pl.BlockSpec((OUT_PAD, tile_n), lambda i: (0, i))

    flops = 2 * n_pad * (FEATURE_COUNT * W_PAD + 2 * W_PAD * W_PAD
                         + W_PAD * OUT_PAD)
    bytes_accessed = int(
        xt.size * xt.dtype.itemsize
        + n_pad * OUT_PAD * 4
        + sum(int(a.size) * a.dtype.itemsize for a in args[1:])
    )
    cost = pl.CostEstimate(flops=flops,
                           transcendentals=n_pad * OUT_PAD,
                           bytes_accessed=bytes_accessed)

    # Explicit VMEM budget with headroom (v7x only has 64 MiB physical VMEM).
    io_bytes = 2 * (FEATURE_COUNT * tile_n * 4 + OUT_PAD * tile_n * 4)
    w_bytes = 2 * sum(int(a.size) * a.dtype.itemsize for a in args[1:])
    act_bytes = 8 * W_PAD * tile_n * 4        # generous activation working set
    vmem_limit = int(min(64 * 1024 * 1024,
                         max(32 * 1024 * 1024, io_bytes + w_bytes + act_bytes)))

    out_t = pl.pallas_call(
        _mlp_kernel,
        out_shape=jax.ShapeDtypeStruct((OUT_PAD, n_pad), jnp.float32),
        grid=grid,
        in_specs=in_specs,
        out_specs=out_specs,
        compiler_params=pltpu.CompilerParams(
            dimension_semantics=("parallel",),    # shard batch tiles across TCs
            vmem_limit_bytes=vmem_limit),
        cost_estimate=cost,
    )(*args)

    out_t = out_t[:OUTPUT_COUNT, :n]
    if transposed_output:
        return out_t
    return jnp.transpose(out_t)


def init_params(key):
    """Deterministic init mimicking PyTorch defaults (Linear: U(-1/sqrt(fan_in), ...))."""
    def linear(key, fan_in, fan_out):
        kw, kb = jax.random.split(key)
        bound = 1.0 / jnp.sqrt(jnp.float32(fan_in))
        # stored as [in, out] so the reference does x @ W
        w = jax.random.uniform(kw, (fan_in, fan_out), jnp.float32, -bound, bound)
        b = jax.random.uniform(kb, (1, fan_out), jnp.float32, -bound, bound)
        return w, b

    k1, k2, k3, k4 = jax.random.split(key, 4)
    w1, b1 = linear(k1, FEATURE_COUNT, WIDTH)
    w2, b2 = linear(k2, WIDTH, WIDTH)
    w3, b3 = linear(k3, WIDTH, WIDTH)
    w4, b4 = linear(k4, WIDTH, OUTPUT_COUNT)
    return {
        # BatchNorm1d default affine init: weight=1, bias=0
        "bn_gamma": jnp.ones((1, FEATURE_COUNT), jnp.float32),
        "bn_beta": jnp.zeros((1, FEATURE_COUNT), jnp.float32),
        "w1": w1, "b1": b1,
        "w2": w2, "b2": b2,
        "w3": w3, "b3": b3,
        "w4": w4, "b4": b4,
    }


def _reference(x, p):
    """Pure-JAX (XLA) reference for correctness checking."""
    x = x.astype(jnp.float32)
    mean = jnp.mean(x, axis=0, keepdims=True)
    var = jnp.mean(jnp.square(x - mean), axis=0, keepdims=True)
    h = (x - mean) * jax.lax.rsqrt(var + BN_EPS) * p["bn_gamma"] + p["bn_beta"]
    h = jnp.maximum(h @ p["w1"] + p["b1"], 0.0)
    h = jnp.maximum(h @ p["w2"] + p["b2"], 0.0)
    h = jnp.maximum(h @ p["w3"] + p["b3"], 0.0)
    y = h @ p["w4"] + p["b4"]
    if SWAP:
        return (jnp.tanh(y) + 1.0) * 0.5 * 0.4 + 0.001
    return (jnp.tanh(y) + 1.0) * 0.5 * 0.9 + 0.1


if __name__ == "__main__":
    key = jax.random.PRNGKey(0)
    kx1, kx2, kp = jax.random.split(key, 3)
    params = init_params(kp)

    # --- small-shape smoke test (single tile), forced f32 for a tight check ---
    batch = 8
    x_small = jax.random.normal(kx1, (batch, FEATURE_COUNT), jnp.float32)
    out = jax.block_until_ready(net_forward(x_small, params, use_bf16=False))
    ref = _reference(x_small, params)
    assert out.shape == (batch, OUTPUT_COUNT)
    assert jnp.allclose(out, ref, atol=1e-4, rtol=1e-4), "f32 mismatch (small batch)"

    # --- multi-tile path (even grid, 4 tiles) in f32 ---
    x_big = jax.random.normal(kx2, (3000, FEATURE_COUNT), jnp.float32)
    ref_big = _reference(x_big, params)
    out_f32 = jax.block_until_ready(
        net_forward(x_big, params, use_bf16=False, tile_rows=1024))
    assert out_f32.shape == (3000, OUTPUT_COUNT)
    assert jnp.allclose(out_f32, ref_big, atol=1e-4, rtol=1e-4), "f32 mismatch (tiled)"

    # --- default (auto) path: bf16 on v6e/v7x, f32 on v5e; looser tolerance ---
    out_auto = jax.block_until_ready(net_forward(x_big, params))
    assert out_auto.shape == (3000, OUTPUT_COUNT)
    assert jnp.allclose(out_auto, ref_big, atol=5e-2, rtol=5e-2), "auto/bf16 mismatch"

    # --- transposed-output fast path returns [OUTPUT_COUNT, N] directly ---
    out_t = jax.block_until_ready(
        net_forward(x_big, params, use_bf16=False, transposed_output=True))
    assert out_t.shape == (OUTPUT_COUNT, 3000)
    assert jnp.allclose(jnp.transpose(out_t), ref_big, atol=1e-4, rtol=1e-4)

    print("KERNEL_OK")
</pallas_src>

<mosaic_0001>
module attributes {stable_mosaic.version = 11 : i64} {
  func.func @_mlp_kernel(%arg0: i32, %arg1: memref<16x128xf32, #tpu.memory_space<vmem>>, %arg2: memref<64x16xf32, #tpu.memory_space<vmem>>, %arg3: memref<64x1xf32, #tpu.memory_space<vmem>>, %arg4: memref<64x64xf32, #tpu.memory_space<vmem>>, %arg5: memref<64x1xf32, #tpu.memory_space<vmem>>, %arg6: memref<64x64xf32, #tpu.memory_space<vmem>>, %arg7: memref<64x1xf32, #tpu.memory_space<vmem>>, %arg8: memref<8x64xf32, #tpu.memory_space<vmem>>, %arg9: memref<8x1xf32, #tpu.memory_space<vmem>>, %arg10: memref<8x128xf32, #tpu.memory_space<vmem>>) attributes {dimension_semantics = [#tpu.dimension_semantics<parallel>], iteration_bounds = array<i64: 1>, scalar_prefetch = 0 : i64, scratch_operands = 0 : i64, tpu.core_type = #tpu.core_type<tc>, window_params = [{transform_indices = @transform_0, window_bounds = array<i64: 16, 128>}, {pipeline_mode = #tpu.pipeline_mode<synchronous>, transform_indices = @transform_1, window_bounds = array<i64: 64, 16>}, {pipeline_mode = #tpu.pipeline_mode<synchronous>, transform_indices = @transform_2, window_bounds = array<i64: 64, 1>}, {pipeline_mode = #tpu.pipeline_mode<synchronous>, transform_indices = @transform_3, window_bounds = array<i64: 64, 64>}, {pipeline_mode = #tpu.pipeline_mode<synchronous>, transform_indices = @transform_4, window_bounds = array<i64: 64, 1>}, {pipeline_mode = #tpu.pipeline_mode<synchronous>, transform_indices = @transform_5, window_bounds = array<i64: 64, 64>}, {pipeline_mode = #tpu.pipeline_mode<synchronous>, transform_indices = @transform_6, window_bounds = array<i64: 64, 1>}, {pipeline_mode = #tpu.pipeline_mode<synchronous>, transform_indices = @transform_7, window_bounds = array<i64: 8, 64>}, {pipeline_mode = #tpu.pipeline_mode<synchronous>, transform_indices = @transform_8, window_bounds = array<i64: 8, 1>}, {transform_indices = @transform_9, window_bounds = array<i64: 8, 128>}]} {
    %c0 = arith.constant 0 : index
    %c0_0 = arith.constant 0 : index
    %0 = vector.load %arg2[%c0, %c0_0] : memref<64x16xf32, #tpu.memory_space<vmem>>, vector<64x16xf32>
    %c0_1 = arith.constant 0 : index
    %c0_2 = arith.constant 0 : index
    %1 = vector.load %arg1[%c0_1, %c0_2] : memref<16x128xf32, #tpu.memory_space<vmem>>, vector<16x128xf32>
    %cst = arith.constant dense<0.000000e+00> : vector<64x128xf32>
    %2 = tpu.matmul %0, %1, %cst {dimension_numbers = #tpu.dot_dimension_numbers<[1], [0], [0], [1], [0, 0, 1, 1], [], []>} : vector<64x16xf32>, vector<16x128xf32>, vector<64x128xf32> -> vector<64x128xf32>
    %c0_3 = arith.constant 0 : index
    %c0_4 = arith.constant 0 : index
    %3 = vector.load %arg3[%c0_3, %c0_4] : memref<64x1xf32, #tpu.memory_space<vmem>>, vector<64x1xf32>
    %4 = vector.broadcast %3 : vector<64x1xf32> to vector<64x128xf32>
    %5 = arith.addf %2, %4 : vector<64x128xf32>
    %cst_5 = arith.constant 0.000000e+00 : f32
    %6 = vector.broadcast %cst_5 : f32 to vector<64x128xf32>
    %7 = arith.maximumf %5, %6 : vector<64x128xf32>
    %c0_6 = arith.constant 0 : index
    %c0_7 = arith.constant 0 : index
    %8 = vector.load %arg4[%c0_6, %c0_7] : memref<64x64xf32, #tpu.memory_space<vmem>>, vector<64x64xf32>
    %cst_8 = arith.constant dense<0.000000e+00> : vector<64x128xf32>
    %9 = tpu.matmul %8, %7, %cst_8 {dimension_numbers = #tpu.dot_dimension_numbers<[1], [0], [0], [1], [0, 0, 1, 1], [], []>} : vector<64x64xf32>, vector<64x128xf32>, vector<64x128xf32> -> vector<64x128xf32>
    %c0_9 = arith.constant 0 : index
    %c0_10 = arith.constant 0 : index
    %10 = vector.load %arg5[%c0_9, %c0_10] : memref<64x1xf32, #tpu.memory_space<vmem>>, vector<64x1xf32>
    %11 = vector.broadcast %10 : vector<64x1xf32> to vector<64x128xf32>
    %12 = arith.addf %9, %11 : vector<64x128xf32>
    %cst_11 = arith.constant 0.000000e+00 : f32
    %13 = vector.broadcast %cst_11 : f32 to vector<64x128xf32>
    %14 = arith.maximumf %12, %13 : vector<64x128xf32>
    %c0_12 = arith.constant 0 : index
    %c0_13 = arith.constant 0 : index
    %15 = vector.load %arg6[%c0_12, %c0_13] : memref<64x64xf32, #tpu.memory_space<vmem>>, vector<64x64xf32>
    %cst_14 = arith.constant dense<0.000000e+00> : vector<64x128xf32>
    %16 = tpu.matmul %15, %14, %cst_14 {dimension_numbers = #tpu.dot_dimension_numbers<[1], [0], [0], [1], [0, 0, 1, 1], [], []>} : vector<64x64xf32>, vector<64x128xf32>, vector<64x128xf32> -> vector<64x128xf32>
    %c0_15 = arith.constant 0 : index
    %c0_16 = arith.constant 0 : index
    %17 = vector.load %arg7[%c0_15, %c0_16] : memref<64x1xf32, #tpu.memory_space<vmem>>, vector<64x1xf32>
    %18 = vector.broadcast %17 : vector<64x1xf32> to vector<64x128xf32>
    %19 = arith.addf %16, %18 : vector<64x128xf32>
    %cst_17 = arith.constant 0.000000e+00 : f32
    %20 = vector.broadcast %cst_17 : f32 to vector<64x128xf32>
    %21 = arith.maximumf %19, %20 : vector<64x128xf32>
    %c0_18 = arith.constant 0 : index
    %c0_19 = arith.constant 0 : index
    %22 = vector.load %arg8[%c0_18, %c0_19] : memref<8x64xf32, #tpu.memory_space<vmem>>, vector<8x64xf32>
    %cst_20 = arith.constant dense<0.000000e+00> : vector<8x128xf32>
    %23 = tpu.matmul %22, %21, %cst_20 {dimension_numbers = #tpu.dot_dimension_numbers<[1], [0], [0], [1], [0, 0, 1, 1], [], []>} : vector<8x64xf32>, vector<64x128xf32>, vector<8x128xf32> -> vector<8x128xf32>
    %c0_21 = arith.constant 0 : index
    %c0_22 = arith.constant 0 : index
    %24 = vector.load %arg9[%c0_21, %c0_22] : memref<8x1xf32, #tpu.memory_space<vmem>>, vector<8x1xf32>
    %25 = vector.broadcast %24 : vector<8x1xf32> to vector<8x128xf32>
    %26 = arith.addf %23, %25 : vector<8x128xf32>
    %27 = math.tanh %26 : vector<8x128xf32>
    %cst_23 = arith.constant 1.000000e+00 : f32
    %28 = vector.broadcast %cst_23 : f32 to vector<8x128xf32>
    %29 = arith.addf %27, %28 : vector<8x128xf32>
    %cst_24 = arith.constant 5.000000e-01 : f32
    %30 = vector.broadcast %cst_24 : f32 to vector<8x128xf32>
    %31 = arith.mulf %29, %30 : vector<8x128xf32>
    %cst_25 = arith.constant 0.899999976 : f32
    %32 = vector.broadcast %cst_25 : f32 to vector<8x128xf32>
    %33 = arith.mulf %31, %32 : vector<8x128xf32>
    %cst_26 = arith.constant 1.000000e-01 : f32
    %34 = vector.broadcast %cst_26 : f32 to vector<8x128xf32>
    %35 = arith.addf %33, %34 : vector<8x128xf32>
    %c0_27 = arith.constant 0 : index
    %c0_28 = arith.constant 0 : index
    %36 = vector.load %arg10[%c0_27, %c0_28] : memref<8x128xf32, #tpu.memory_space<vmem>>, vector<8x128xf32>
    tpu.vector_store %arg10[%c0_27, %c0_28], %35 {strides = array<i32>} : memref<8x128xf32, #tpu.memory_space<vmem>>, vector<8x128xf32>,
    return
  }
  func.func @transform_0(%arg0: i32) -> (i32, i32) {
    %c0_i32 = arith.constant 0 : i32
    %c0_i32_0 = arith.constant 0 : i32
    return %c0_i32, %arg0 : i32, i32
  }
  func.func @transform_1(%arg0: i32) -> (i32, i32) {
    %c0_i32 = arith.constant 0 : i32
    %c0_i32_0 = arith.constant 0 : i32
    %c0_i32_1 = arith.constant 0 : i32
    return %c0_i32, %c0_i32_0 : i32, i32
  }
  func.func @transform_2(%arg0: i32) -> (i32, i32) {
    %c0_i32 = arith.constant 0 : i32
    %c0_i32_0 = arith.constant 0 : i32
    %c0_i32_1 = arith.constant 0 : i32
    return %c0_i32, %c0_i32_0 : i32, i32
  }
  func.func @transform_3(%arg0: i32) -> (i32, i32) {
    %c0_i32 = arith.constant 0 : i32
    %c0_i32_0 = arith.constant 0 : i32
    %c0_i32_1 = arith.constant 0 : i32
    return %c0_i32, %c0_i32_0 : i32, i32
  }
  func.func @transform_4(%arg0: i32) -> (i32, i32) {
    %c0_i32 = arith.constant 0 : i32
    %c0_i32_0 = arith.constant 0 : i32
    %c0_i32_1 = arith.constant 0 : i32
    return %c0_i32, %c0_i32_0 : i32, i32
  }
  func.func @transform_5(%arg0: i32) -> (i32, i32) {
    %c0_i32 = arith.constant 0 : i32
    %c0_i32_0 = arith.constant 0 : i32
    %c0_i32_1 = arith.constant 0 : i32
    return %c0_i32, %c0_i32_0 : i32, i32
  }
  func.func @transform_6(%arg0: i32) -> (i32, i32) {
    %c0_i32 = arith.constant 0 : i32
    %c0_i32_0 = arith.constant 0 : i32
    %c0_i32_1 = arith.constant 0 : i32
    return %c0_i32, %c0_i32_0 : i32, i32
  }
  func.func @transform_7(%arg0: i32) -> (i32, i32) {
    %c0_i32 = arith.constant 0 : i32
    %c0_i32_0 = arith.constant 0 : i32
    %c0_i32_1 = arith.constant 0 : i32
    return %c0_i32, %c0_i32_0 : i32, i32
  }
  func.func @transform_8(%arg0: i32) -> (i32, i32) {
    %c0_i32 = arith.constant 0 : i32
    %c0_i32_0 = arith.constant 0 : i32
    %c0_i32_1 = arith.constant 0 : i32
    return %c0_i32, %c0_i32_0 : i32, i32
  }
  func.func @transform_9(%arg0: i32) -> (i32, i32) {
    %c0_i32 = arith.constant 0 : i32
    %c0_i32_0 = arith.constant 0 : i32
    return %c0_i32, %arg0 : i32, i32
  }
}

</mosaic_0001>

<bundles_post_ra>
// kernel: tpu_custom_call.1
= control target key start
LH: loop header
LB: loop body
LE: loop exit
PB: predicated region body
PF: predicated region fallthrough
CT: control target
= control target key end

     0   :  { %vm91_vm0 = vcmask 130048   ;;  %v913_v4 = vmov 0   ;;  %s1151_s0 = inlined_call_operand.vmem [shape: f32[16,128], index: 0, kind: input, shape index: {}]   ;;  %s1152_s1 = inlined_call_operand.vmem [shape: f32[64,16], index: 1, kind: input, shape index: {}]   ;;  %s1153_s2 = inlined_call_operand.vmem [shape: f32[64,1], index: 2, kind: input, shape index: {}]   ;;  %s1154_s3 = inlined_call_operand.vmem [shape: f32[64,64], index: 3, kind: input, shape index: {}]   ;;  %s1155_s4 = inlined_call_operand.vmem [shape: f32[64,1], index: 4, kind: input, shape index: {}]   ;;  %s1156_s5 = inlined_call_operand.vmem [shape: f32[64,64], index: 5, kind: input, shape index: {}]   ;;  %s1157_s6 = inlined_call_operand.vmem [shape: f32[64,1], index: 6, kind: input, shape index: {}]   ;;  %s1158_s7 = inlined_call_operand.vmem [shape: f32[8,64], index: 7, kind: input, shape index: {}]   ;;  %s1159_s8 = inlined_call_operand.vmem [shape: f32[8,1], index: 8, kind: input, shape index: {}]   ;;  %s1160_s9 = inlined_call_operand.hbm [shape: f32[8,128], index: 9, kind: output, shape index: {}]  }
   0x1   :  { %v42_v0 = vld [vmem:[%s1151_s0 + $0x8] sm:$0xff]  ;;  %v41_v1 = vld [vmem:[%s1151_s0] sm:$0xff]  ;;  %887 = vset.pattern.permute.xlu0 %v913_v4  ;;  %v35_v5 = vld [vmem:[%s1152_s1 + $0x10] sm:$0xff]  ;;  %888 = vset.pattern.permute.xlu1 %v913_v4 }
   0x2   :  { %v33_v2 = vld [vmem:[%s1152_s1] sm:$0xff]  ;;  %792 = vmatprep.subr.mxu0 %v42_v0  ;;  %v34_v3 = vld [vmem:[%s1152_s1 + $0x8] sm:$0xff]  ;;  %v50_v6 = vld [vmem:[%s1153_s2 + $0x38] sm:$0xff] }
   0x3   :  { %796 = vmatprep.mubr.msk.f32.mxu0 %vm91_vm0, %v33_v2  ;;  %793 = vmatpush3.msra.mxu0 %v42_v0  ;;  %v48_v7 = vld [vmem:[%s1153_s2 + $0x28] sm:$0xff]  ;;  %v49_v8 = vld [vmem:[%s1153_s2 + $0x30] sm:$0xff]  ;;  %v36_v9 = vld [vmem:[%s1152_s1 + $0x18] sm:$0xff] }
   0x4   :  { %794 = vmatprep.subr.mxu0 %v41_v1  ;;  %88 = vperm.xlu0 %887, %v50_v6   ;;  %v47_v10 = vld [vmem:[%s1153_s2 + $0x20] sm:$0xff]  ;;  %v46_v12 = vld [vmem:[%s1153_s2 + $0x18] sm:$0xff]  ;;  %v38_v13 = vld [vmem:[%s1152_s1 + $0x28] sm:$0xff] }
   0x5   :  { %795 = vmatpush3.msra.mxu0 %v41_v1  ;;  %78 = vperm.xlu1 %888, %v48_v7   ;;  %v37_v11 = vld [vmem:[%s1152_s1 + $0x20] sm:$0xff]  ;;  %v45_v14 = vld [vmem:[%s1153_s2 + $0x10] sm:$0xff] }
   0x6   :  { %797 = vmatmul.mubr.msk.f32.vlgmr.msra.gmra.mxu0 %vm91_vm0, %v34_v3  ;;  %v39_v15 = vld [vmem:[%s1152_s1 + $0x30] sm:$0xff] }
   0x7   :  { %799 = vmatprep.mubr.msk.f32.mxu0 %vm91_vm0, %v35_v5 }
   0x8   :  { %83 = vperm.xlu0 %887, %v49_v8  }
   0x9   :  { %73 = vperm.xlu1 %888, %v47_v10  }
   0xa   :  { %800 = vmatmul.mubr.msk.f32.gmra.mxu0 %vm91_vm0, %v36_v9 }
   0xb   :  { %802 = vmatprep.mubr.msk.f32.mxu0 %vm91_vm0, %v37_v11 }
   0xc   :  { %14 = vsyncpa [#allocation3], 0  ;;  %68 = vperm.xlu0 %887, %v46_v12   ;;  %v44_v16 = vld [vmem:[%s1153_s2 + $0x8] sm:$0xff]  ;;  %v40_v17 = vld [vmem:[%s1152_s1 + $0x38] sm:$0xff]  ;;  %vm285_vm1 = vcmask 523264   ;;  %vm915_vm2 = vmmov 0  }
   0xd   :  { %63 = vperm.xlu1 %888, %v45_v14   ;;  %v43_v18 = vld [vmem:[%s1153_s2] sm:$0xff]  ;;  %v244_v19 = vld [vmem:[%s1155_s4 + $0x38] sm:$0xff]  ;;  %v243_v20 = vld [vmem:[%s1155_s4 + $0x30] sm:$0xff]  ;;  %s916_s11 = smov [#allocation2]  }
   0xe   :  { %803 = vmatmul.mubr.msk.f32.gmra.mxu0 %vm91_vm0, %v38_v13  ;;  %v242_v21 = vld [vmem:[%s1155_s4 + $0x28] sm:$0xff]  ;;  %v241_v22 = vld [vmem:[%s1155_s4 + $0x20] sm:$0xff]  ;;  %v240_v23 = vld [vmem:[%s1155_s4 + $0x18] sm:$0xff]  ;;  %s708_s12 = sshll.u32 %s916_s11, 4  ;;  %s709_s12 = int_to_ptr.vmem [resolvable:$true] %s708_s12 }
   0xf   :  { %805 = vmatprep.mubr.msk.f32.mxu0 %vm91_vm0, %v39_v15  ;;  %v239_v24 = vld [vmem:[%s1155_s4 + $0x10] sm:$0xff]  ;;  %v238_v25 = vld [vmem:[%s1155_s4 + $0x8] sm:$0xff]  ;;  %v237_v26 = vld [vmem:[%s1155_s4] sm:$0xff]  ;;  %s891_s13 = scalar_lea.vmem %s709_s12, 128  ;;  %p896_p1 = scmp.lt.s32.totalorder %s709_s12, %s709_s12 }
  0x10   :  { %58 = vperm.xlu0 %887, %v44_v16   ;;  %v438_v27 = vld [vmem:[%s1157_s6 + $0x38] sm:$0xff]  ;;  %v437_v28 = vld [vmem:[%s1157_s6 + $0x30] sm:$0xff]  ;;  %v436_v29 = vld [vmem:[%s1157_s6 + $0x28] sm:$0xff]  ;;  %p892_p0 = scmp.ne.s32.totalorder %s709_s12, %s891_s13  ;;  %p897_p2 = scmp.lt.s32.totalorder %s891_s13, %s891_s13 }
  0x11   :  { %53 = vperm.xlu1 %888, %v43_v18   ;;  %v435_v30 = vld [vmem:[%s1157_s6 + $0x20] sm:$0xff]  ;;  %v434_v31 = vld [vmem:[%s1157_s6 + $0x18] sm:$0xff]  ;;  %v433_v32 = vld [vmem:[%s1157_s6 + $0x10] sm:$0xff] }
  0x12   :  { %806 = vmatmul.mubr.msk.f32.gmra.mxu0 %vm91_vm0, %v40_v17  ;;  %v432_v33 = vld [vmem:[%s1157_s6 + $0x8] sm:$0xff]  ;;  %v431_v34 = vld [vmem:[%s1157_s6] sm:$0xff]  ;;  %v231_v6 = vld [vmem:[%s1154_s3 + $0x10] sm:$0xff]  ;;  %p898_p3 = por %p897_p2, %p896_p1 }
  0x13   :  { %v617_v35 = vld [vmem:[%s1159_s8] sm:$0xff]  ;;  %v230_v5 = vld [vmem:[%s1154_s3 + $0x8] sm:$0xff]  ;;  %v232_v7 = vld [vmem:[%s1154_s3 + $0x18] sm:$0xff] }
  0x14   :  { %282 = vperm.xlu0 %887, %v244_v19   ;;  %v229_v36 = vld [vmem:[%s1154_s3] sm:$0xff]  ;;  %v234_v9 = vld [vmem:[%s1154_s3 + $0x28] sm:$0xff]  ;;  %v235_v10 = vld [vmem:[%s1154_s3 + $0x30] sm:$0xff]  ;;  %p899_p4 = pnand %p898_p3, %p892_p0 }
  0x15   :  { %277 = vperm.xlu1 %888, %v243_v20   ;;  %824 = vmatprep.mubr.msk.f32.mxu1 %vm285_vm1, %v229_v36  ;;  %v233_v8 = vld [vmem:[%s1154_s3 + $0x20] sm:$0xff]  ;;  %v236_v11 = vld [vmem:[%s1154_s3 + $0x38] sm:$0xff] }
  0x16   :  { %v423_v12 = vld [vmem:[%s1156_s5] sm:$0xff] }
  0x17   :  { %852 = vmatprep.mubr.msk.f32.mxu0 %vm285_vm1, %v423_v12 }
  0x18   :  { %272 = vperm.xlu0 %887, %v242_v21  }
  0x19   :  { %267 = vperm.xlu1 %888, %v241_v22  }
  0x1c   :  { %262 = vperm.xlu0 %887, %v240_v23  }
  0x1d   :  { %257 = vperm.xlu1 %888, %v239_v24  }
  0x20   :  { %252 = vperm.xlu0 %887, %v238_v25  }
  0x21   :  { %247 = vperm.xlu1 %888, %v237_v26  }
  0x24   :  { %476 = vperm.xlu0 %887, %v438_v27  }
  0x25   :  { %471 = vperm.xlu1 %888, %v437_v28  }
  0x28   :  { %466 = vperm.xlu0 %887, %v436_v29  }
  0x29   :  { %461 = vperm.xlu1 %888, %v435_v30  }
  0x2c   :  { %456 = vperm.xlu0 %887, %v434_v31  }
  0x2d   :  { %451 = vperm.xlu1 %888, %v433_v32  }
  0x30   :  { %446 = vperm.xlu0 %887, %v432_v33  }
  0x31   :  { %441 = vperm.xlu1 %888, %v431_v34  }
  0x34   :  { %620 = vperm.xlu0 %887, %v617_v35  }
  0x7f   :  { %v89_v39 = vpop.permute.xlu0 %88 }
  0x80   :  { %v79_v41 = vpop.permute.xlu1 %78 }
  0x83   :  { %v84_v44 = vpop.permute.xlu0 %83 }
  0x84   :  { %v74_v46 = vpop.permute.xlu1 %73 }
  0x87   :  { %v69_v53 = vpop.permute.xlu0 %68 }
  0x88   :  { %v64_v56 = vpop.permute.xlu1 %63 }
  0x8b   :  { %v59_v61 = vpop.permute.xlu0 %58 }
  0x8c   :  { %v54_v0 = vpop.permute.xlu1 %53 }
  0x8f   :  { %v283_v15 = vpop.permute.xlu0 %282 }
  0x90   :  { %v278_v17 = vpop.permute.xlu1 %277 }
  0x93   :  { %v273_v20 = vpop.permute.xlu0 %272 }
  0x94   :  { %v268_v22 = vpop.permute.xlu1 %267 }
  0x97   :  { %v263_v29 = vpop.permute.xlu0 %262 }
  0x98   :  { %v258_v32 = vpop.permute.xlu1 %257 }
  0xc6   :  { %v798_v37 = vpop.f32.mrf.mxu0 }
  0xc7   :  { %v188_v62 = vadd.f32 %v798_v37, %v59_v61  ;;  %v253_v37 = vpop.permute.xlu0 %252 }
  0xc8   :  { %v182_v38 = vpop.f32.mrf.mxu0 }
  0xc9   :  { %v183_v1 = vadd.f32 %v182_v38, %v54_v0  ;;  %v222_v3 = vmax.f32 %v188_v62, 0.0 }
  0xca   :  { %v801_v40 = vpop.f32.mrf.mxu0 }
  0xcb   :  { %v198_v57 = vadd.f32 %v801_v40, %v69_v53  ;;  %v221_v4 = vmax.f32 %v183_v1, 0.0  ;;  %v248_v40 = vpop.permute.xlu1 %247 }
  0xcc   :  { %v192_v42 = vpop.f32.mrf.mxu0 }
  0xcd   :  { %v193_v59 = vadd.f32 %v192_v42, %v64_v56  ;;  %v224_v63 = vmax.f32 %v198_v57, 0.0 }
  0xce   :  { %v804_v43 = vpop.f32.mrf.mxu0 }
  0xcf   :  { %v208_v50 = vadd.f32 %v804_v43, %v79_v41  ;;  %v223_v2 = vmax.f32 %v193_v59, 0.0  ;;  %v472_v57 = vpop.permute.xlu1 %471 }
  0xd0   :  { %v202_v45 = vpop.f32.mrf.mxu0 }
  0xd1   :  { %v203_v54 = vadd.f32 %v202_v45, %v74_v46  ;;  %v226_v58 = vmax.f32 %v208_v50, 0.0  ;;  %v424_v45 = vld [vmem:[%s1156_s5 + $0x8] sm:$0xff]  ;;  %v425_v46 = vld [vmem:[%s1156_s5 + $0x10] sm:$0xff] }
  0xd2   :  { %v807_v47 = vpop.f32.mrf.mxu0  ;;  %v429_v50 = vld [vmem:[%s1156_s5 + $0x30] sm:$0xff] }
  0xd3   :  { %v218_v48 = vadd.f32 %v807_v47, %v89_v39  ;;  %v225_v60 = vmax.f32 %v203_v54, 0.0  ;;  %v426_v47 = vld [vmem:[%s1156_s5 + $0x18] sm:$0xff]  ;;  %v462_v62 = vpop.permute.xlu1 %461 }
  0xd4   :  { %v212_v49 = vpop.f32.mrf.mxu0 }
  0xd5   :  { %v228_v51 = vmax.f32 %v218_v48, 0.0  ;;  %v213_v52 = vadd.f32 %v212_v49, %v84_v44  ;;  %v427_v48 = vld [vmem:[%s1156_s5 + $0x20] sm:$0xff]  ;;  %v428_v49 = vld [vmem:[%s1156_s5 + $0x28] sm:$0xff] }
  0xd7   :  { %v227_v55 = vmax.f32 %v213_v52, 0.0  ;;  %808 = vmatprep.subr.mxu1 %v228_v51  ;;  %v914_v52 = vmov 0.0  }
  0xd8   :  { %809 = vmatpush3.msra.mxu1 %v228_v51  ;;  %v430_v51 = vld [vmem:[%s1156_s5 + $0x38] sm:$0xff] }
  0xd9   :  { %810 = vmatprep.subr.mxu1 %v227_v55 }
  0xda   :  { %811 = vmatpush3.msra.mxu1 %v227_v55  ;;  %v477_v55 = vpop.permute.xlu0 %476 }
  0xdb   :  { %812 = vmatprep.subr.mxu1 %v226_v58 }
  0xdc   :  { %813 = vmatpush3.msra.mxu1 %v226_v58 }
  0xdd   :  { %814 = vmatprep.subr.mxu1 %v225_v60 }
  0xde   :  { %815 = vmatpush3.msra.mxu1 %v225_v60  ;;  %v467_v60 = vpop.permute.xlu0 %466 }
  0xdf   :  { %816 = vmatprep.subr.mxu1 %v224_v63 }
  0xe0   :  { %817 = vmatpush3.msra.mxu1 %v224_v63 }
  0xe1   :  { %818 = vmatprep.subr.mxu1 %v223_v2 }
  0xe2   :  { %819 = vmatpush3.msra.mxu1 %v223_v2 }
  0xe3   :  { %820 = vmatprep.subr.mxu1 %v222_v3 }
  0xe4   :  { %821 = vmatpush3.msra.mxu1 %v222_v3 }
  0xe5   :  { %822 = vmatprep.subr.mxu1 %v221_v4 }
  0xe6   :  { %823 = vmatpush3.msra.mxu1 %v221_v4 }
  0xe7   :  { %825 = vmatmul.mubr.msk.f32.vlgmr.msra.gmra.mxu1 %vm285_vm1, %v230_v5  ;;  %864 = vmatprep.subr.mxu1 %v914_v52  ;;  %v457_v5 = vpop.permute.xlu0 %456 }
  0xe8   :  { %827 = vmatprep.mubr.msk.f32.mxu1 %vm285_vm1, %v231_v6 }
  0xeb   :  { %828 = vmatmul.mubr.msk.f32.gmra.mxu1 %vm285_vm1, %v232_v7 }
  0xec   :  { %830 = vmatprep.mubr.msk.f32.mxu1 %vm285_vm1, %v233_v8  ;;  %v452_v8 = vpop.permute.xlu1 %451 }
  0xef   :  { %831 = vmatmul.mubr.msk.f32.gmra.mxu1 %vm285_vm1, %v234_v9 }
  0xf0   :  { %833 = vmatprep.mubr.msk.f32.mxu1 %vm285_vm1, %v235_v10 }
  0xf3   :  { %834 = vmatmul.mubr.msk.f32.gmra.mxu1 %vm285_vm1, %v236_v11 }
  0xf4   :  { %880 = vmatprep.mubr.msk.f32.mxu1 %vm915_vm2, %v914_v52 }
 0x1a7   :  { %v826_v13 = vpop.f32.mrf.mxu1 }
 0x1a8   :  { %v382_v38 = vadd.f32 %v826_v13, %v253_v37  ;;  %v447_v13 = vpop.permute.xlu0 %446 }
 0x1a9   :  { %v376_v14 = vpop.f32.mrf.mxu1 }
 0x1aa   :  { %v377_v41 = vadd.f32 %v376_v14, %v248_v40  ;;  %v416_v43 = vmax.f32 %v382_v38, 0.0 }
 0x1ab   :  { %v829_v16 = vpop.f32.mrf.mxu1 }
 0x1ac   :  { %v392_v33 = vadd.f32 %v829_v16, %v263_v29  ;;  %v415_v44 = vmax.f32 %v377_v41, 0.0  ;;  %v442_v16 = vpop.permute.xlu1 %441 }
 0x1ad   :  { %v386_v18 = vpop.f32.mrf.mxu1 }
 0x1ae   :  { %v387_v35 = vadd.f32 %v386_v18, %v258_v32  ;;  %v418_v39 = vmax.f32 %v392_v33, 0.0 }
 0x1af   :  { %v832_v19 = vpop.f32.mrf.mxu1 }
 0x1b0   :  { %v402_v26 = vadd.f32 %v832_v19, %v273_v20  ;;  %v417_v42 = vmax.f32 %v387_v35, 0.0 }
 0x1b1   :  { %v396_v21 = vpop.f32.mrf.mxu1 }
 0x1b2   :  { %v397_v30 = vadd.f32 %v396_v21, %v268_v22  ;;  %v420_v34 = vmax.f32 %v402_v26, 0.0  ;;  %v616_v21 = vld [vmem:[%s1158_s7] sm:$0xff]  ;;  %v621_v22 = vpop.permute.xlu0 %620 }
 0x1b3   :  { %v835_v23 = vpop.f32.mrf.mxu1 }
 0x1b4   :  { %v412_v24 = vadd.f32 %v835_v23, %v283_v15  ;;  %v419_v36 = vmax.f32 %v397_v30, 0.0 }
 0x1b5   :  { %v406_v25 = vpop.f32.mrf.mxu1 }
 0x1b6   :  { %v422_v27 = vmax.f32 %v412_v24, 0.0  ;;  %v407_v28 = vadd.f32 %v406_v25, %v278_v17 }
 0x1b8   :  { %v421_v31 = vmax.f32 %v407_v28, 0.0  ;;  %836 = vmatprep.subr.mxu0 %v422_v27 }
 0x1b9   :  { %837 = vmatpush3.msra.mxu0 %v422_v27 }
 0x1ba   :  { %838 = vmatprep.subr.mxu0 %v421_v31 }
 0x1bb   :  { %839 = vmatpush3.msra.mxu0 %v421_v31 }
 0x1bc   :  { %840 = vmatprep.subr.mxu0 %v420_v34 }
 0x1bd   :  { %841 = vmatpush3.msra.mxu0 %v420_v34 }
 0x1be   :  { %842 = vmatprep.subr.mxu0 %v419_v36 }
 0x1bf   :  { %843 = vmatpush3.msra.mxu0 %v419_v36 }
 0x1c0   :  { %844 = vmatprep.subr.mxu0 %v418_v39 }
 0x1c1   :  { %845 = vmatpush3.msra.mxu0 %v418_v39 }
 0x1c2   :  { %846 = vmatprep.subr.mxu0 %v417_v42 }
 0x1c3   :  { %847 = vmatpush3.msra.mxu0 %v417_v42 }
 0x1c4   :  { %848 = vmatprep.subr.mxu0 %v416_v43 }
 0x1c5   :  { %849 = vmatpush3.msra.mxu0 %v416_v43 }
 0x1c6   :  { %850 = vmatprep.subr.mxu0 %v415_v44 }
 0x1c7   :  { %851 = vmatpush3.msra.mxu0 %v415_v44 }
 0x1c8   :  { %853 = vmatmul.mubr.msk.f32.vlgmr.msra.gmra.mxu0 %vm285_vm1, %v424_v45 }
 0x1c9   :  { %855 = vmatprep.mubr.msk.f32.mxu0 %vm285_vm1, %v425_v46 }
 0x1cc   :  { %856 = vmatmul.mubr.msk.f32.gmra.mxu0 %vm285_vm1, %v426_v47 }
 0x1cd   :  { %858 = vmatprep.mubr.msk.f32.mxu0 %vm285_vm1, %v427_v48 }
 0x1d0   :  { %859 = vmatmul.mubr.msk.f32.gmra.mxu0 %vm285_vm1, %v428_v49 }
 0x1d1   :  { %861 = vmatprep.mubr.msk.f32.mxu0 %vm285_vm1, %v429_v50 }
 0x1d4   :  { %862 = vmatmul.mubr.msk.f32.gmra.mxu0 %vm285_vm1, %v430_v51 }
 0x288   :  { %v854_v53 = vpop.f32.mrf.mxu0 }
 0x289   :  { %v575_v14 = vadd.f32 %v854_v53, %v447_v13 }
 0x28a   :  { %v569_v54 = vpop.f32.mrf.mxu0 }
 0x28b   :  { %v570_v17 = vadd.f32 %v569_v54, %v442_v16  ;;  %v609_v19 = vmax.f32 %v575_v14, 0.0 }
 0x28c   :  { %v857_v56 = vpop.f32.mrf.mxu0 }
 0x28d   :  { %v585_v9 = vadd.f32 %v857_v56, %v457_v5  ;;  %v608_v20 = vmax.f32 %v570_v17, 0.0 }
 0x28e   :  { %v579_v58 = vpop.f32.mrf.mxu0 }
 0x28f   :  { %v580_v11 = vadd.f32 %v579_v58, %v452_v8  ;;  %v611_v15 = vmax.f32 %v585_v9, 0.0 }
 0x290   :  { %v860_v59 = vpop.f32.mrf.mxu0 }
 0x291   :  { %v595_v2 = vadd.f32 %v860_v59, %v467_v60  ;;  %v610_v18 = vmax.f32 %v580_v11, 0.0 }
 0x292   :  { %v589_v61 = vpop.f32.mrf.mxu0 }
 0x293   :  { %v590_v6 = vadd.f32 %v589_v61, %v462_v62  ;;  %v613_v10 = vmax.f32 %v595_v2, 0.0 }
 0x294   :  { %v863_v63 = vpop.f32.mrf.mxu0 }
 0x295   :  { %v605_v0 = vadd.f32 %v863_v63, %v477_v55  ;;  %v612_v12 = vmax.f32 %v590_v6, 0.0 }
 0x296   :  { %v599_v1 = vpop.f32.mrf.mxu0 }
 0x297   :  { %v615_v3 = vmax.f32 %v605_v0, 0.0  ;;  %v600_v4 = vadd.f32 %v599_v1, %v472_v57 }
 0x299   :  { %v614_v7 = vmax.f32 %v600_v4, 0.0  ;;  %865 = vmatpush3.msra.mxu1 %v615_v3 }
 0x29a   :  { %866 = vmatprep.subr.mxu1 %v914_v52 }
 0x29b   :  { %867 = vmatpush3.msra.mxu1 %v614_v7 }
 0x29c   :  { %868 = vmatprep.subr.mxu1 %v914_v52 }
 0x29d   :  { %869 = vmatpush3.msra.mxu1 %v613_v10 }
 0x29e   :  { %870 = vmatprep.subr.mxu1 %v914_v52 }
 0x29f   :  { %871 = vmatpush3.msra.mxu1 %v612_v12 }
 0x2a0   :  { %872 = vmatprep.subr.mxu1 %v914_v52 }
 0x2a1   :  { %873 = vmatpush3.msra.mxu1 %v611_v15 }
 0x2a2   :  { %874 = vmatprep.subr.mxu1 %v914_v52 }
 0x2a3   :  { %875 = vmatpush3.msra.mxu1 %v610_v18 }
 0x2a4   :  { %876 = vmatprep.subr.mxu1 %v914_v52 }
 0x2a5   :  { %877 = vmatpush3.msra.mxu1 %v609_v19 }
 0x2a6   :  { %878 = vmatprep.subr.mxu1 %v914_v52 }
 0x2a7   :  { %879 = vmatpush3.msra.mxu1 %v608_v20 }
 0x2a8   :  { %881 = vmatmul.mubr.msk.f32.vlgmr.msra.gmra.mxu1 %vm285_vm1, %v616_v21 }
 0x368   :  { %v692_v23 = vpop.f32.mrf.mxu1 }
 0x369   :  { %v693_v24 = vadd.f32 %v692_v23, %v621_v22 }
 0x36a   :  { %v882_v25 = vpop.f32.mrf.mxu1 }
 0x36b   :  { %889 = vtanh.f32 %v693_v24 }
 0x378   :  { %v890_v26 = vpop.eup %889 }
 0x379   :  { %v697_v27 = vadd.f32 1.0, %v890_v26 }
 0x37b   :  { %v698_v28 = vmul.f32 0.5, %v697_v27 }
 0x37d   :  { %v699_v29 = vmul.f32 0.9, %v698_v28 }
 0x37f   :  { %v700_v30 = vadd.f32 0.1, %v699_v29 }
 0x381   :  { %701 = vst [vmem:[#allocation2] sm:$0xff] %v700_v30 }
 0x382   :  { %902 = shalt.err (!%p899_p4)
}
 0x383   :  { %711 = dma.vmem_to_hbm [thread:$0]  %s709_s12, 128, %s1160_s9, [#allocation3]  }
 0x384   :  { %911 = dma.done.wait [#allocation3], 128  }
 0x385   :  { %912 = vsyncadd [#allocation3], 4294967168 }
 0x386   :  { %715 = vsyncpa [#allocation3], 1 }

</bundles_post_ra>
